<compile_context>
chip_gen: v6e
topology: v6e:2x2x1
jax: 0.10.0
libtpu: 0.0.40
codegen_flags: <defaults>
</compile_context>

<pallas_src>
import functools

import jax
import jax.numpy as jnp
import numpy as np
from jax.experimental import pallas as pl
from jax.experimental.pallas import tpu as pltpu


# ----------------------------------------------------------------------------
# Kernel 1: assemble class prompts.
# grid = (class_tiles, batch). Scalar-prefetched `indices` (batch, T) in SMEM
# drive a dynamic gather from the prompt pool (resident in VMEM, DMA'd once);
# prefix + gathered ctx are written as one contiguous store, the suffix as a
# second bulk store (or a VMEM->VMEM DMA when suffix_via_dma=True).
# ----------------------------------------------------------------------------
def _assemble_prompts_kernel(n_tp, pool_rows, suffix_via_dma,
                             idx_ref, prefix_ref, pool_ref, suffix_ref,
                             out_ref, *scratch):
    b = pl.program_id(1)                      # batch index (inner grid axis)
    ct = prefix_ref.shape[0]                  # classes in this tile
    n_ctx = pool_ref.shape[1]
    D = pool_ref.shape[2]
    ctx_len = n_tp * n_ctx

    # Bulk suffix copy: plain vreg copy-through (default; hidden under HBM
    # writeback on v5e/v6e) or offloaded to the DMA engine (v7x, where the
    # faster HBM no longer hides store-slot work).
    copy = None
    if suffix_via_dma:
        copy = pltpu.make_async_copy(
            suffix_ref, out_ref.at[0, :, 1 + ctx_len:, :], scratch[0])
        copy.start()
    else:
        out_ref[0, :, 1 + ctx_len:, :] = suffix_ref[...]

    # Gather the T pool rows once (clamped: dynamic VMEM reads are unchecked,
    # so out-of-range indices are remapped to valid rows instead of faulting —
    # unlike the PyTorch reference, which would raise), stack them into one
    # (ctx_len, D) slab, fold the 1-row prefix in, and emit a single
    # contiguous store covering rows [0, 1 + ctx_len).
    rows = [pool_ref[jnp.clip(idx_ref[b, t], 0, pool_rows - 1)]
            for t in range(n_tp)]
    ctx = rows[0] if n_tp == 1 else jnp.concatenate(rows, axis=0)
    head = jnp.concatenate(
        [prefix_ref[...], jnp.broadcast_to(ctx[None], (ct, ctx_len, D))],
        axis=1)
    out_ref[0, :, :1 + ctx_len, :] = head

    if suffix_via_dma:
        copy.wait()


# ----------------------------------------------------------------------------
# Kernel 2: only_prefix() — assemble the "no-class" prompts, tiled over pool.
# One aligned full-block store per tile.
# ----------------------------------------------------------------------------
def _assemble_nc_kernel(nc_prefix_ref, ctx_ref, nc_suffix_ref, out_ref):
    pt, n_ctx, D = ctx_ref.shape
    nc_suf_len = nc_suffix_ref.shape[1]
    out_ref[...] = jnp.concatenate(
        [jnp.broadcast_to(nc_prefix_ref[...], (pt, 1, D)),
         ctx_ref[...],
         jnp.broadcast_to(nc_suffix_ref[...], (pt, nc_suf_len, D))],
        axis=1)


# ----------------------------------------------------------------------------
# VMEM accounting helpers (for class-tile auto-selection + vmem_limit_bytes).
# ----------------------------------------------------------------------------
def _vmem_need_bytes(ct, seq, D, suf_len, pool, n_ctx, itemsize, nbuf_const):
    out_b = 2 * ct * seq * D                                # output, 2 buffers
    const_b = nbuf_const * (ct * 1 * D + ct * suf_len * D + pool * n_ctx * D)
    return itemsize * (out_b + const_b)


def _pick_class_tile(n_cls, requested, seq, D, suf_len, pool, n_ctx, itemsize,
                     nbuf_const, budget_bytes):
    """Largest divisor of n_cls that is <= requested and fits the VMEM budget.

    Using divisors only means no remainder tile is ever needed (a requested
    tile like 32 for n_cls=100 falls back to 25).
    """
    cap = n_cls if requested is None else max(1, min(int(requested), n_cls))
    best = 1
    for ct in range(1, cap + 1):
        if n_cls % ct:
            continue
        if ct == 1 or _vmem_need_bytes(ct, seq, D, suf_len, pool, n_ctx,
                                       itemsize, nbuf_const) <= budget_bytes:
            best = ct
    return best


def only_prefix(text_prompt, nc_token_prefix, nc_token_suffix,
                nc_tokenized_prompts, pool_tile=64):
    pool, n_ctx, D = text_prompt.shape
    nc_suf_len = nc_token_suffix.shape[1]
    seq = 1 + n_ctx + nc_suf_len
    # Largest divisor of `pool` <= pool_tile: pipelined tiles (DMA-in /
    # stores / DMA-out overlap) without a remainder tile.
    pt = max(d for d in range(1, min(pool, max(1, pool_tile)) + 1)
             if pool % d == 0)

    nc_prompts = pl.pallas_call(
        _assemble_nc_kernel,
        out_shape=jax.ShapeDtypeStruct((pool, seq, D), text_prompt.dtype),
        grid=(pool // pt,),
        in_specs=[
            pl.BlockSpec((1, 1, D), lambda i: (0, 0, 0)),
            pl.BlockSpec((pt, n_ctx, D), lambda i: (i, 0, 0)),
            pl.BlockSpec((1, nc_suf_len, D), lambda i: (0, 0, 0)),
        ],
        out_specs=pl.BlockSpec((pt, seq, D), lambda i: (i, 0, 0)),
        compiler_params=pltpu.CompilerParams(
            dimension_semantics=("parallel",)),
    )(nc_token_prefix, text_prompt, nc_token_suffix)

    nc_tok = jnp.tile(nc_tokenized_prompts, (pool, 1))     # integer glue
    return nc_prompts, nc_tok


def prompt_learner_forward(indices, text_prompt, token_prefix, token_suffix,
                           nc_token_prefix, nc_token_suffix,
                           tokenized_prompts, nc_tokenized_prompts,
                           infer=False, class_tile=None, out_dtype=None,
                           vmem_budget_bytes=None, core_parallel=False,
                           single_buffer_constants=False,
                           suffix_via_dma=False, pool_tile=64):
    # One-time cast: the kernel is pure output-writeback bound, so emitting
    # bf16 (out_dtype=jnp.bfloat16) halves HBM traffic and VMEM block size.
    if out_dtype is not None:
        text_prompt = text_prompt.astype(out_dtype)
        token_prefix = token_prefix.astype(out_dtype)
        token_suffix = token_suffix.astype(out_dtype)
        nc_token_prefix = nc_token_prefix.astype(out_dtype)
        nc_token_suffix = nc_token_suffix.astype(out_dtype)

    batch, n_tp = indices.shape
    pool, n_ctx, D = text_prompt.shape
    n_cls = token_prefix.shape[0]
    suf_len = token_suffix.shape[1]
    seq = 1 + n_tp * n_ctx + suf_len
    itemsize = jnp.dtype(text_prompt.dtype).itemsize

    # Generation-aware sizing: budget ~half the physical VMEM for this call
    # (v5e/v6e 128 MiB -> whole n_cls usually untiled; v7x 64 MiB -> tiled).
    try:
        phys_vmem = int(pltpu.get_tpu_info().vmem_capacity_bytes)
    except Exception:                      # conservative fallback (v7x-sized)
        phys_vmem = 64 * 1024 * 1024
    if vmem_budget_bytes is None:
        vmem_budget_bytes = phys_vmem // 2

    nbuf_const = 1 if single_buffer_constants else 2
    ct = _pick_class_tile(n_cls, class_tile, seq, D, suf_len, pool, n_ctx,
                          itemsize, nbuf_const, vmem_budget_bytes)
    nct = n_cls // ct
    need = _vmem_need_bytes(ct, seq, D, suf_len, pool, n_ctx, itemsize,
                            nbuf_const)
    vmem_limit = int(min(max(need * 1.25 + (1 << 20), 32 * 1024 * 1024),
                         max(phys_vmem - 8 * 1024 * 1024, 32 * 1024 * 1024)))

    # Inputs whose block index is constant (pool) or changes only once per
    # class tile (prefix/suffix) can be single-buffered to free VMEM for a
    # bigger class tile (most useful on v7x).
    def const_spec(shape, index_map):
        if single_buffer_constants:
            return pl.BlockSpec(shape, index_map, pipeline_mode=pl.Buffered(1))
        return pl.BlockSpec(shape, index_map)

    scratch_shapes = [pltpu.SemaphoreType.DMA(())] if suffix_via_dma else []

    kernel = functools.partial(_assemble_prompts_kernel, n_tp, pool,
                               suffix_via_dma)
    prompts4 = pl.pallas_call(
        kernel,
        out_shape=jax.ShapeDtypeStruct((batch, n_cls, seq, D),
                                       text_prompt.dtype),
        grid_spec=pltpu.PrefetchScalarGridSpec(
            num_scalar_prefetch=1,
            # class-tile axis outer, batch inner: prefix/suffix block indices
            # are constant over the inner axis -> DMA'd once per class tile;
            # the pool block index is constant -> DMA'd once total.
            grid=(nct, batch),
            in_specs=[
                const_spec((ct, 1, D), lambda c, b, idx: (c, 0, 0)),
                const_spec((pool, n_ctx, D), lambda c, b, idx: (0, 0, 0)),
                const_spec((ct, suf_len, D), lambda c, b, idx: (c, 0, 0)),
            ],
            out_specs=pl.BlockSpec((1, ct, seq, D),
                                   lambda c, b, idx: (b, c, 0, 0)),
            scratch_shapes=scratch_shapes,
        ),
        compiler_params=pltpu.CompilerParams(
            dimension_semantics=(
                (pltpu.CORE_PARALLEL if core_parallel else "parallel"),
                "parallel"),
            vmem_limit_bytes=vmem_limit),
    )(indices, token_prefix, text_prompt, token_suffix)

    # TODO(synk): structurally the batch x n_cls replication could be avoided
    #   entirely by fusing prefix/ctx/suffix assembly into the text-encoder
    #   consumer; that changes the module interface, so it is not done here.
    prompts = prompts4.reshape(batch * n_cls, seq, D)
    tok = jnp.tile(tokenized_prompts[None], (batch, 1, 1)).reshape(
        batch * n_cls, -1)

    if infer:
        return prompts, tok

    nc_prompts, nc_tok = only_prefix(text_prompt, nc_token_prefix,
                                     nc_token_suffix, nc_tokenized_prompts,
                                     pool_tile=pool_tile)
    return prompts, tok, nc_prompts, nc_tok


if __name__ == "__main__":
    # Small synthetic configuration (consistent with the module's shapes):
    #   ctx_dim D=128 (lane-dense; real CLIP uses 512), n_ctx=4,
    #   args.text_prompt T=2, n_cls=6, prompt pool=5, tokenized sequence
    #   length SEQ=16 (stand-in for CLIP's 77), batch=2.
    D, n_ctx, T, n_cls, pool, SEQ, batch = 128, 4, 2, 6, 5, 16, 2
    suf_len = SEQ - 1 - n_ctx * T          # 7
    nc_suf_len = SEQ - 1 - n_ctx           # 11
    dtype = jnp.float32

    key = jax.random.PRNGKey(0)
    ks = jax.random.split(key, 8)

    text_prompt = jax.random.normal(ks[0], (pool, n_ctx, D), dtype)
    token_prefix = jax.random.normal(ks[1], (n_cls, 1, D), dtype)
    token_suffix = jax.random.normal(ks[2], (n_cls, suf_len, D), dtype)
    nc_token_prefix = jax.random.normal(ks[3], (1, 1, D), dtype)
    nc_token_suffix = jax.random.normal(ks[4], (1, nc_suf_len, D), dtype)
    tokenized_prompts = jax.random.randint(ks[5], (n_cls, SEQ), 0, 1000,
                                           jnp.int32)
    nc_tokenized_prompts = jax.random.randint(ks[6], (1, SEQ), 0, 1000,
                                              jnp.int32)
    indices = jax.random.randint(ks[7], (batch, T), 0, pool, jnp.int32)

    # --- pure-JAX reference ---
    ctx = text_prompt[indices].reshape(batch, T * n_ctx, D)
    prefix_b = jnp.broadcast_to(token_prefix[None], (batch, n_cls, 1, D))
    suffix_b = jnp.broadcast_to(token_suffix[None], (batch, n_cls, suf_len, D))
    ctx_b = jnp.broadcast_to(ctx[:, None], (batch, n_cls, T * n_ctx, D))
    ref_prompts = jnp.concatenate([prefix_b, ctx_b, suffix_b],
                                  axis=2).reshape(batch * n_cls, SEQ, D)
    ref_tok = jnp.tile(tokenized_prompts[None], (batch, 1, 1)).reshape(
        batch * n_cls, SEQ)
    ref_nc = jnp.concatenate(
        [jnp.broadcast_to(nc_token_prefix, (pool, 1, D)),
         text_prompt,
         jnp.broadcast_to(nc_token_suffix, (pool, nc_suf_len, D))], axis=1)
    ref_nc_tok = jnp.tile(nc_tokenized_prompts, (pool, 1))

    # 1) default path: auto class tile (whole n_cls fits the budget here).
    prompts, tok, nc_prompts, nc_tok = jax.block_until_ready(
        prompt_learner_forward(indices, text_prompt, token_prefix,
                               token_suffix, nc_token_prefix, nc_token_suffix,
                               tokenized_prompts, nc_tokenized_prompts))
    np.testing.assert_allclose(np.asarray(prompts), np.asarray(ref_prompts),
                               rtol=0, atol=0)
    np.testing.assert_array_equal(np.asarray(tok), np.asarray(ref_tok))
    np.testing.assert_allclose(np.asarray(nc_prompts), np.asarray(ref_nc),
                               rtol=0, atol=0)
    np.testing.assert_array_equal(np.asarray(nc_tok), np.asarray(ref_nc_tok))

    # 2) requested class_tile=4 does NOT divide n_cls=6 -> wrapper falls back
    #    to the largest divisor (3): exercises multi-tile grid, remainder-safe.
    prompts2, tok2 = jax.block_until_ready(
        prompt_learner_forward(indices, text_prompt, token_prefix,
                               token_suffix, nc_token_prefix, nc_token_suffix,
                               tokenized_prompts, nc_tokenized_prompts,
                               infer=True, class_tile=4))
    np.testing.assert_allclose(np.asarray(prompts2), np.asarray(ref_prompts),
                               rtol=0, atol=0)
    np.testing.assert_array_equal(np.asarray(tok2), np.asarray(ref_tok))

    print("KERNEL_OK")
</pallas_src>

<mosaic_0001>
module attributes {stable_mosaic.version = 11 : i64} {
  func.func @_assemble_prompts_kernel(%arg0: i32, %arg1: i32, %arg2: memref<2x2xi32, #tpu.memory_space<smem>>, %arg3: memref<6x1x128xf32, #tpu.memory_space<vmem>>, %arg4: memref<5x4x128xf32, #tpu.memory_space<vmem>>, %arg5: memref<6x7x128xf32, #tpu.memory_space<vmem>>, %arg6: memref<1x6x16x128xf32, #tpu.memory_space<vmem>>) attributes {dimension_semantics = [#tpu.dimension_semantics<parallel>, #tpu.dimension_semantics<parallel>], iteration_bounds = array<i64: 1, 2>, scalar_prefetch = 1 : i64, scratch_operands = 0 : i64, tpu.core_type = #tpu.core_type<tc>, window_params = [{transform_indices = @transform_0, window_bounds = array<i64: 6, 1, 128>}, {pipeline_mode = #tpu.pipeline_mode<synchronous>, transform_indices = @transform_1, window_bounds = array<i64: 5, 4, 128>}, {transform_indices = @transform_2, window_bounds = array<i64: 6, 7, 128>}, {transform_indices = @transform_3, window_bounds = array<i64: 1, 6, 16, 128>}]} {
    %c0 = arith.constant 0 : index
    %c0_0 = arith.constant 0 : index
    %c0_1 = arith.constant 0 : index
    %0 = vector.load %arg5[%c0, %c0_0, %c0_1] : memref<6x7x128xf32, #tpu.memory_space<vmem>>, vector<6x7x128xf32>
    %c0_2 = arith.constant 0 : index
    %c0_3 = arith.constant 0 : index
    %c9 = arith.constant 9 : index
    %c0_4 = arith.constant 0 : index
    %1 = vector.load %arg6[%c0_2, %c0_3, %c9, %c0_4] : memref<1x6x16x128xf32, #tpu.memory_space<vmem>>, vector<1x6x7x128xf32>
    %2 = vector.shape_cast %1 : vector<1x6x7x128xf32> to vector<6x7x128xf32>
    %3 = vector.shape_cast %0 : vector<6x7x128xf32> to vector<1x6x7x128xf32>
    tpu.vector_store %arg6[%c0_2, %c0_3, %c9, %c0_4], %3 {strides = array<i32>} : memref<1x6x16x128xf32, #tpu.memory_space<vmem>>, vector<1x6x7x128xf32>,
    %4 = arith.index_cast %arg1 : i32 to index
    %c0_5 = arith.constant 0 : index
    %5 = memref.load %arg2[%4, %c0_5] : memref<2x2xi32, #tpu.memory_space<smem>>
    %c0_i32 = arith.constant 0 : i32
    %c4_i32 = arith.constant 4 : i32
    %6 = arith.maxsi %c0_i32, %5 : i32
    %7 = arith.minsi %c4_i32, %6 : i32
    %8 = arith.index_cast %7 : i32 to index
    %c0_6 = arith.constant 0 : index
    %c0_7 = arith.constant 0 : index
    %9 = vector.load %arg4[%8, %c0_6, %c0_7] : memref<5x4x128xf32, #tpu.memory_space<vmem>>, vector<1x4x128xf32>
    %10 = vector.shape_cast %9 : vector<1x4x128xf32> to vector<4x128xf32>
    %11 = arith.index_cast %arg1 : i32 to index
    %c1 = arith.constant 1 : index
    %12 = memref.load %arg2[%11, %c1] : memref<2x2xi32, #tpu.memory_space<smem>>
    %c0_i32_8 = arith.constant 0 : i32
    %c4_i32_9 = arith.constant 4 : i32
    %13 = arith.maxsi %c0_i32_8, %12 : i32
    %14 = arith.minsi %c4_i32_9, %13 : i32
    %15 = arith.index_cast %14 : i32 to index
    %c0_10 = arith.constant 0 : index
    %c0_11 = arith.constant 0 : index
    %16 = vector.load %arg4[%15, %c0_10, %c0_11] : memref<5x4x128xf32, #tpu.memory_space<vmem>>, vector<1x4x128xf32>
    %17 = vector.shape_cast %16 : vector<1x4x128xf32> to vector<4x128xf32>
    %18 = tpu.concatenate %10, %17 in 0 : vector<4x128xf32>, vector<4x128xf32> -> vector<8x128xf32>
    %c0_12 = arith.constant 0 : index
    %c0_13 = arith.constant 0 : index
    %c0_14 = arith.constant 0 : index
    %19 = vector.load %arg3[%c0_12, %c0_13, %c0_14] : memref<6x1x128xf32, #tpu.memory_space<vmem>>, vector<6x1x128xf32>
    %20 = vector.shape_cast %18 : vector<8x128xf32> to vector<1x8x128xf32>
    %21 = vector.shape_cast %20 : vector<1x8x128xf32> to vector<1x8x128xf32>
    %22 = vector.broadcast %21 : vector<1x8x128xf32> to vector<6x8x128xf32>
    %23 = tpu.concatenate %19, %22 in 1 : vector<6x1x128xf32>, vector<6x8x128xf32> -> vector<6x9x128xf32>
    %c0_15 = arith.constant 0 : index
    %c0_16 = arith.constant 0 : index
    %c0_17 = arith.constant 0 : index
    %c0_18 = arith.constant 0 : index
    %24 = vector.load %arg6[%c0_15, %c0_16, %c0_17, %c0_18] : memref<1x6x16x128xf32, #tpu.memory_space<vmem>>, vector<1x6x9x128xf32>
    %25 = vector.shape_cast %24 : vector<1x6x9x128xf32> to vector<6x9x128xf32>
    %26 = vector.shape_cast %23 : vector<6x9x128xf32> to vector<1x6x9x128xf32>
    tpu.vector_store %arg6[%c0_15, %c0_16, %c0_17, %c0_18], %26 {strides = array<i32>} : memref<1x6x16x128xf32, #tpu.memory_space<vmem>>, vector<1x6x9x128xf32>,
    return
  }
  func.func @transform_0(%arg0: i32, %arg1: i32, %arg2: memref<2x2xi32, #tpu.memory_space<smem>>) -> (i32, i32, i32) {
    %c0_i32 = arith.constant 0 : i32
    %c0_i32_0 = arith.constant 0 : i32
    %c0_i32_1 = arith.constant 0 : i32
    return %arg0, %c0_i32, %c0_i32_0 : i32, i32, i32
  }
  func.func @transform_1(%arg0: i32, %arg1: i32, %arg2: memref<2x2xi32, #tpu.memory_space<smem>>) -> (i32, i32, i32) {
    %c0_i32 = arith.constant 0 : i32
    %c0_i32_0 = arith.constant 0 : i32
    %c0_i32_1 = arith.constant 0 : i32
    %c0_i32_2 = arith.constant 0 : i32
    return %c0_i32, %c0_i32_0, %c0_i32_1 : i32, i32, i32
  }
  func.func @transform_2(%arg0: i32, %arg1: i32, %arg2: memref<2x2xi32, #tpu.memory_space<smem>>) -> (i32, i32, i32) {
    %c0_i32 = arith.constant 0 : i32
    %c0_i32_0 = arith.constant 0 : i32
    %c0_i32_1 = arith.constant 0 : i32
    return %arg0, %c0_i32, %c0_i32_0 : i32, i32, i32
  }
  func.func @transform_3(%arg0: i32, %arg1: i32, %arg2: memref<2x2xi32, #tpu.memory_space<smem>>) -> (i32, i32, i32, i32) {
    %c0_i32 = arith.constant 0 : i32
    %c0_i32_0 = arith.constant 0 : i32
    %c0_i32_1 = arith.constant 0 : i32
    return %arg1, %arg0, %c0_i32, %c0_i32_0 : i32, i32, i32, i32
  }
}

</mosaic_0001>

<bundles_post_ra>
// kernel: tpu_custom_call.1
= control target key start
LH: loop header
LB: loop body
LE: loop exit
PB: predicated region body
PF: predicated region fallthrough
CT: control target
= control target key end

     0   :  { %s712_s15 = smov [#allocation3]   ;;  %s946_s0 = inlined_call_operand.hbm [shape: s32[2,2], index: 0, kind: input, shape index: {}]   ;;  %s947_s1 = inlined_call_operand.hbm [shape: f32[6,1,128], index: 1, kind: input, shape index: {}]   ;;  %s948_s2 = inlined_call_operand.hbm [shape: f32[5,4,128], index: 2, kind: input, shape index: {}]   ;;  %s949_s3 = inlined_call_operand.hbm [shape: f32[6,7,128], index: 3, kind: input, shape index: {}]   ;;  %s950_s4 = inlined_call_operand.hbm [shape: f32[2,6,16,128], index: 4, kind: output, shape index: {}]  }
   0x1   :  { %10 = dma.hbm_to_smem %s946_s0, 32, %s712_s15, [#allocation2] }
   0x2   :  { %674 = dma.done.wait [#allocation2], 32 }
   0x3   :  { %675 = vsyncadd [#allocation2], 4294967264 }
   0x4   :  { %12 = sfence }
   0x5   :  { %13 = vsyncpa [#allocation5], 0 }
   0x6   :  { %14 = vsyncpa [#allocation8], 0 }
   0x7   :  { %15 = vsyncpa [#allocation6], 0 }
   0x8   :  { %17 = vsyncpa [#allocation6 + $0x1], 0  ;;  %s753_s18 = smov 0   ;;  %s755_s19 = smov 0  }
   0x9   :  { %s757_s20 = smov 0   ;;  %s759_s21 = smov 0  }
   0xa   :  { %s761_s22 = smov 0   ;;  %s763_s23 = smov 0  }
   0xb LB: > { %s411_s0 = sadd.s32 4294967295, %s710_s23   ;;  %s412_s24 = sadd.s32 4294967294, %s710_s23   ;;  %s710_s23 = sphi %s763_s23, %s23_s23   ;;  %s706_s22 = sphi %s761_s22, %s961_s22   ;;  %s702_s21 = sphi %s759_s21, %s960_s21   ;;  %s698_s20 = sphi %s757_s20, %s959_s20   ;;  %s694_s19 = sphi %s755_s19, %s958_s19   ;;  %s690_s18 = sphi %s753_s18, %s957_s18  }
   0xc   : > { %s32_s25 = sadd.s32 1, %s706_s22  ;;  %s117_s26 = sadd.s32 1, %s698_s20 }
   0xd   : > { %p33_p0 = scmp.ge.s32.totalorder %s32_s25, 2  ;;  %p127_p1 = scmp.ne.s32.totalorder %s698_s20, %s694_s19 }
   0xe   : > { %p128_p2 = scmp.eq.s32.totalorder %s411_s0, 1  ;;  %p133_p3 = scmp.ne.s32.totalorder %s694_s19, %s690_s18 }
   0xf   : > { %s963_s25 = smov (%p33_p0, %s32_s25), 0  ;;  %p134_p5 = scmp.eq.s32.totalorder %s412_s24, 1 }
  0x10   : > { %p793_p4 = por %p128_p2, %p127_p1  ;;  %s112_s28 = ssub.s32 %s706_s22, %s963_s25 }
  0x11   : > { %p413_p6 = scmp.ge.s32.totalorder %s710_s23, 1  ;;  %p115_p7 = scmp.eq.s32.totalorder %s112_s28, 0 }
  0x12   : > { %p800_p8 = por %p134_p5, %p133_p3  ;;  %p141_p9 = scmp.lt.s32.totalorder %s710_s23, 3 }
  0x13   : > { %s806_s30 = scalar_select %p115_p7, %s698_s20, %s117_s26  }
  0x14   : > { %s952_s29 = scalar_select %p800_p8, 1, 0 }
  0x15   : > { %p808_p10 = pnand %p413_p6, %p141_p9  ;;  %p812_p11 = scmp.eq.s32.totalorder %s411_s0, 0 }
  0x16   : > { %s713_s7 = smov [#allocation7]   ;;  %s714_s10 = smov [#allocation4]  }
  0x17   : > { %p457_p12 = pneg %p808_p10  ;;  %s169_s8 = sshll.u32 %s713_s7, 4  ;;  %s170_s8 = int_to_ptr.vmem [resolvable:$true] %s169_s8 }
  0x18   : > { %s156_s11 = sshll.u32 %s714_s10, 4  ;;  %s557_s12 = scalar_lea.vmem %s170_s8, 320  ;;  %s157_s11 = int_to_ptr.vmem [resolvable:$true] %s156_s11 }
  0x19   : > { %p820_p13 = pnand %p812_p11, %p457_p12  ;;  %p558_p1 = scmp.ne.s32.totalorder %s170_s8, %s557_s12 }
  0x1a   : > { %p565_p5 = scmp.lt.s32.totalorder %s170_s8, %s170_s8  ;;  %p566_p6 = scmp.lt.s32.totalorder %s557_s12, %s557_s12 }
  0x1b   : > { %p548_p0 = pneg %p820_p13 }
  0x1c   : > { %p567_p7 = por %p566_p6, %p565_p5 }
  0x1d   : > { %p560_p2 = pnand %p558_p1, %p548_p0 }
  0x1f   : > { %p561_p3 = pneg %p560_p2 }
  0x21   : > { %p568_p9 = pnand %p567_p7, %p561_p3 }
  0x23   : > { %571 = shalt.err (!%p568_p9)
}
  0x24   : > { %s715_s13 = smov 64   ;;  %s716_s14 = smov 4  }
  0x25   : > { %463 = dma.hbm_to_vmem [thread:$0]  (!%p820_p13), %s948_s2, 320, %s170_s8, [#allocation8], %s715_s13, %s715_s13, %s716_s14  }
  0x26   : > { %s583_s17 = scalar_lea.vmem %s157_s11, 96  ;;  %p591_p8 = scmp.lt.s32.totalorder %s157_s11, %s157_s11 }
  0x27   : > { %p584_p12 = scmp.ne.s32.totalorder %s157_s11, %s583_s17  ;;  %p592_p5 = scmp.lt.s32.totalorder %s583_s17, %s583_s17 }
  0x29   : > { %p586_p1 = pnand %p584_p12, %p548_p0  ;;  %p593_p3 = por %p592_p5, %p591_p8 }
  0x2b   : > { %p587_p2 = pneg %p586_p1 }
  0x2d   : > { %p594_p6 = pnand %p593_p3, %p587_p2 }
  0x2f   : > { %597 = shalt.err (!%p594_p6)
}
  0x30   : > { %s717_s0 = smov 16   ;;  %s718_s24 = smov 1  }
  0x31   : > { %460 = dma.hbm_to_vmem [thread:$0]  (!%p820_p13), %s947_s1, 96, %s157_s11, [#allocation5], %s717_s0, %s717_s0, %s718_s24  }
  0x32   : > { %s719_s7 = smov [#allocation9]  }
  0x33   : > { %s185_s8 = sshll.u32 %s719_s7, 4  ;;  %s186_s8 = int_to_ptr.vmem [resolvable:$true] %s185_s8 }
  0x34   : > { %s609_s10 = scalar_lea.vmem %s186_s8, 768  ;;  %p617_p12 = scmp.lt.s32.totalorder %s186_s8, %s186_s8 }
  0x35   : > { %p610_p7 = scmp.ne.s32.totalorder %s186_s8, %s609_s10  ;;  %p618_p1 = scmp.lt.s32.totalorder %s609_s10, %s609_s10 }
  0x37   : > { %p612_p9 = pnand %p610_p7, %p548_p0  ;;  %p619_p2 = por %p618_p1, %p617_p12 }
  0x39   : > { %p613_p8 = pneg %p612_p9 }
  0x3b   : > { %p620_p5 = pnand %p619_p2, %p613_p8 }
  0x3d   : > { %623 = shalt.err (!%p620_p5)
}
  0x3e   : > { %s720_s12 = smov 128   ;;  %s721_s13 = smov 8  }
  0x3f   : > { %466 = dma.hbm_to_vmem [thread:$0]  (!%p820_p13), %s949_s3, 768, %s186_s8, [#allocation8], %s720_s12, %s720_s12, %s721_s13  }
  0x40   : > { %201 = sbr.rel (%p808_p10) target bundleno = 112 (0x70), region = 32 }
  0x45   : > { %677 = dma.done.wait (%p812_p11), [#allocation5], 96  }
  0x46   : > { %679 = vsyncadd (%p812_p11), [#allocation5], 4294967200 }
  0x47   : > { %681 = dma.done.wait (%p812_p11), [#allocation8], 1088  }
  0x48   : > { %683 = vsyncadd (%p812_p11), [#allocation8], 4294966208  ;;  %s225_s9 = sand.u32 1, %s694_s19   ;;  %s421_s15 = sshll.u32 %s702_s21, 7  ;;  %v231_v0 = vld [vmem:[#allocation9] sm:$0x7f] }
  0x49   : > { %s441_s5 = smul.u32 96, %s225_s9  ;;  %s244_s16 = sld [smem:[#allocation3 + %s421_s15]]  ;;  %v232_v1 = vld [vmem:[#allocation9 + $0x8] sm:$0x7f]  ;;  %v233_v2 = vld [vmem:[#allocation9 + $0x10] sm:$0x7f] }
  0x4a   : > { %s252_s17 = sadd.s32 1, %s421_s15  ;;  %v234_v3 = vld [vmem:[#allocation9 + $0x18] sm:$0x7f]  ;;  %v235_v4 = vld [vmem:[#allocation9 + $0x20] sm:$0x7f]  ;;  %vm264_vm0 = vcmask 1043456  }
  0x4b   : > { %s253_s0 = sld [smem:[#allocation3 + %s252_s17]]  ;;  %s864_s24 = scalar_lea.vmem [#allocation10], %s441_s5  ;;  %v236_v5 = vld [vmem:[#allocation9 + $0x28] sm:$0x7f]  ;;  %v266_v9 = vld [vmem:[#allocation4] sm:$0x1] }
  0x4c   : > { %237 = vst [vmem:[%s864_s24 + $0x9] sm:$0x7f] %v231_v0  ;;  %238 = vst [vmem:[%s864_s24 + $0x19] sm:$0x7f] %v232_v1  ;;  %vm275_vm1 = vcmask 1040384   ;;  %s442_s8 = smul.u32 1536, %s702_s21 }
  0x4d   : > { %239 = vst [vmem:[%s864_s24 + $0x29] sm:$0x7f] %v233_v2  ;;  %240 = vst [vmem:[%s864_s24 + $0x39] sm:$0x7f] %v234_v3  ;;  %s311_s10 = sshll.u32 %s864_s24, 4  ;;  %s901_s14 = scalar_lea.sflag [#allocation6], %s225_s9  ;;  %s874_s10 = int_to_ptr.vmem [resolvable:$true] %s311_s10 }
  0x4e   : > { %241 = vst [vmem:[%s864_s24 + $0x49] sm:$0x7f] %v235_v4  ;;  %242 = vst [vmem:[%s864_s24 + $0x59] sm:$0x7f] %v236_v5  ;;  %v267_v11 = vld [vmem:[#allocation4 + $0x1] sm:$0x1]  ;;  %s889_s13 = scalar_lea.hbm %s950_s4, %s442_s8 }
  0x4f   : > { %p245_p10 = scmp.gt.s32.totalorder %s244_s16, 0  ;;  %p422_p11 = scmp.lt.s32.totalorder %s244_s16, 4  ;;  %v268_v12 = vld [vmem:[#allocation4 + $0x2] sm:$0x1]  ;;  %v269_v13 = vld [vmem:[#allocation4 + $0x3] sm:$0x1] }
  0x50   : > { %v270_v15 = vld [vmem:[#allocation4 + $0x4] sm:$0x1]  ;;  %v271_v16 = vld [vmem:[#allocation4 + $0x5] sm:$0x1]  ;;  %s624_s11 = scalar_lea.vmem %s874_s10, 1536  ;;  %s722_s15 = smov [#allocation10]  }
  0x51   : > { %p254_p13 = scmp.gt.s32.totalorder %s253_s0, 0  ;;  %p428_p0 = scmp.lt.s32.totalorder %s253_s0, 4 }
  0x52   : > { %s965_s16 = smov (!%p245_p10, %s244_s16), 0  ;;  %p625_p3 = scmp.ne.s32.totalorder %s874_s10, %s624_s11 }
  0x53   : > { %s967_s0 = smov (!%p254_p13, %s253_s0), 0  ;;  %s969_s16 = smov (!%p422_p11, %s965_s16), 4 }
  0x54   : > { %s971_s0 = smov (!%p428_p0, %s967_s0), 4  ;;  %s427_s6 = sshll.u32 %s969_s16, 2 }
  0x55   : > { %s433_s26 = sshll.u32 %s971_s0, 2  ;;  %s250_s28 = scalar_lea.vmem [#allocation7], %s427_s6 }
  0x56   : > { %v251_v6 = vld [vmem:[%s250_s28] sm:$0xf]  ;;  %s259_s7 = scalar_lea.vmem [#allocation7], %s433_s26  ;;  %p626_p6 = pnand %p625_p3, %p793_p4 }
  0x57   : > { %v260_v7 = vld [vmem:[%s259_s7] sm:$0xf]  ;;  %s628_s5 = sshll.u32 %s722_s15, 4  ;;  %s629_s5 = int_to_ptr.vmem [resolvable:$false] %s628_s5 }
  0x58   : > { %v262_v8 = vrot.slane %v260_v7, 4  ;;  %p627_p7 = pneg %p626_p6  ;;  %s630_s16 = scalar_lea.vmem %s629_s5, 3072 }
  0x59   : > { %p631_p9 = scmp.lt.s32.totalorder %s874_s10, %s629_s5  ;;  %p632_p8 = scmp.lt.s32.totalorder %s630_s16, %s624_s11 }
  0x5a   : > { %v265_v10 = vsel %vm264_vm0, %v251_v6, %v262_v8 }
  0x5b   : > { %v273_v14 = vrot.slane %v265_v10, 7  ;;  %p633_p12 = por %p632_p8, %p631_p9 }
  0x5d   : > { %v276_v17 = vsel %vm275_vm1, %v266_v9, %v273_v14  ;;  %283 = vst [vmem:[%s864_s24 + $0x8] sm:$0x1] %v273_v14  ;;  %285 = vst [vmem:[%s864_s24 + $0x18] sm:$0x1] %v273_v14  ;;  %v277_v18 = vsel %vm275_vm1, %v267_v11, %v273_v14  ;;  %v278_v19 = vsel %vm275_vm1, %v268_v12, %v273_v14  ;;  %p634_p1 = pnand %p633_p12, %p627_p7 }
  0x5e   : > { %287 = vst [vmem:[%s864_s24 + $0x28] sm:$0x1] %v273_v14  ;;  %289 = vst [vmem:[%s864_s24 + $0x38] sm:$0x1] %v273_v14  ;;  %v279_v20 = vsel %vm275_vm1, %v269_v13, %v273_v14  ;;  %v280_v21 = vsel %vm275_vm1, %v270_v15, %v273_v14  ;;  %v281_v22 = vsel %vm275_vm1, %v271_v16, %v273_v14 }
  0x5f   : > { %291 = vst [vmem:[%s864_s24 + $0x48] sm:$0x1] %v273_v14  ;;  %293 = vst [vmem:[%s864_s24 + $0x58] sm:$0x1] %v273_v14 }
  0x60   : > { %282 = vst [vmem:[%s864_s24] sm:$0xff] %v276_v17  ;;  %284 = vst [vmem:[%s864_s24 + $0x10] sm:$0xff] %v277_v18 }
  0x61   : > { %286 = vst [vmem:[%s864_s24 + $0x20] sm:$0xff] %v278_v19  ;;  %288 = vst [vmem:[%s864_s24 + $0x30] sm:$0xff] %v279_v20 }
  0x62   : > { %290 = vst [vmem:[%s864_s24 + $0x40] sm:$0xff] %v280_v21  ;;  %292 = vst [vmem:[%s864_s24 + $0x50] sm:$0xff] %v281_v22 }
  0x63   : > { %637 = shalt.err (!%p634_p1)
}
  0x64   : > { %s638_s9 = scalar_lea.hbm %s889_s13, 1536  ;;  %s642_s24 = scalar_lea.hbm %s950_s4, 3072 }
  0x65   : > { %p639_p2 = scmp.ne.s32.totalorder %s889_s13, %s638_s9  ;;  %p643_p11 = scmp.lt.s32.totalorder %s889_s13, %s950_s4 }
  0x66   : > { %p644_p13 = scmp.lt.s32.totalorder %s642_s24, %s638_s9 }
  0x67   : > { %p640_p5 = pnand %p639_p2, %p793_p4 }
  0x68   : > { %p645_p0 = por %p644_p13, %p643_p11 }
  0x69   : > { %p641_p10 = pneg %p640_p5 }
  0x6b   : > { %p646_p3 = pnand %p645_p0, %p641_p10 }
  0x6d   : > { %649 = shalt.err (!%p646_p3)
}
  0x6e   : > { %s723_s28 = smov 128   ;;  %s724_s7 = smov 8  }
  0x6f   : > { %455 = dma.vmem_to_hbm [thread:$0]  (%p793_p4), %s874_s10, 1536, %s889_s13, %s901_s14, %s723_s28, %s723_s28, %s724_s7  }
  0x70 PF: > { %p477_p6 = scmp.ge.s32.totalorder %s710_s23, 2  ;;  %s326_s8 = sand.u32 1, %s690_s18  }
  0x71   : > { %p956_p7 = scmp.ne.s32.totalorder %s952_s29, 0  ;;  %s327_s21 = scalar_lea.sflag [#allocation6], %s326_s8 }
  0x73   : > { %p468_p9 = pnand %p477_p6, %p956_p7 }
  0x75   : > { %p469_p8 = pneg %p468_p9 }
  0x77   : > { %685 = dma.done.wait (%p469_p8), %s327_s21, 1536  }
  0x78   : > { %687 = vsyncadd (%p469_p8), %s327_s21, 4294965760  ;;  %s23_s23 = sadd.s32 1, %s710_s23   ;;  %s957_s18 = smov %s694_s19 }
  0x79   : > { %p20_p12 = scmp.ge.s32.totalorder %s23_s23, 4   ;;  %s958_s19 = smov %s698_s20 }
  0x7a   : > { %s959_s20 = smov %s806_s30  ;;  %s960_s21 = smov %s706_s22 }
  0x7b   : > { %s961_s22 = smov %s963_s25  ;;  %22 = sbr.rel (!%p20_p12) target bundleno = 11 (0xb), region = 81 }
  0x80   :  { %332 = vsyncpa [#allocation5], 1 }
  0x81   :  { %334 = vsyncpa [#allocation5 + $0x1], 1 }
  0x82   :  { %335 = vsyncpa [#allocation8], 1 }
  0x83   :  { %336 = vsyncpa [#allocation6], 1 }
  0x84   :  { %338 = vsyncpa [#allocation6 + $0x1], 1 }

</bundles_post_ra>
